<compile_context>
chip_gen: v6e
topology: v6e:2x2x1
jax: 0.10.0
libtpu: 0.0.40
codegen_flags: <defaults>
</compile_context>

<pallas_src>
import jax
import jax.numpy as jnp
import numpy as np
from jax.experimental import pallas as pl
from jax.experimental.pallas import tpu as pltpu


# ----------------------------------------------------------------------------- helpers
def _leaky_relu(x, negative_slope):
    return jnp.where(x >= 0, x, negative_slope * x)


def _layer_norm_1pass(x, gamma, beta, eps):
    """One-pass LayerNorm: single sweep producing mean and mean-of-squares."""
    mu = jnp.mean(x, axis=-1, keepdims=True)
    ms = jnp.mean(x * x, axis=-1, keepdims=True)
    var = ms - mu * mu
    return (x - mu) * jax.lax.rsqrt(var + eps) * gamma + beta


def _layer_norm_2pass(x, gamma, beta, eps):
    """Classic two-pass LayerNorm (reference only)."""
    mu = jnp.mean(x, axis=-1, keepdims=True)
    var = jnp.mean(jnp.square(x - mu), axis=-1, keepdims=True)
    return (x - mu) * jax.lax.rsqrt(var + eps) * gamma + beta


def _round_up(x, n):
    return ((x + n - 1) // n) * n


def _choose_tile_m(m, max_tile=2048, split_threshold=1024):
    """Row-tile heuristic:
    - as big as possible to amortize the ~0.35us per-grid-step pipeline overhead,
    - never (much) bigger than the problem,
    - capped at max_tile,
    - once the problem is big enough, split into >= 2 tiles so v7x's two
      TensorCores both get work via dimension_semantics=("parallel",)."""
    m8 = _round_up(m, 8)
    if m8 <= split_threshold:
        return m8
    half = _round_up((m8 + 1) // 2, 8)
    return min(max_tile, half)


# ----------------------------------------------------------------------------- kernel
def _make_kernel(*, eps, negative_slope, use_norm, has_bypass, mxu_dtype):
    """Fused ResidualBlock kernel for one (tile_m, feat_in) row tile."""

    def kernel(*refs):
        if has_bypass:
            (x_ref, g1_ref, be1_ref, w1_ref, b1_ref,
             g2_ref, be2_ref, w2_ref, b2_ref, wb_ref, o_ref) = refs
        else:
            (x_ref, g1_ref, be1_ref, w1_ref, b1_ref,
             g2_ref, be2_ref, w2_ref, b2_ref, o_ref) = refs
            wb_ref = None

        x = x_ref[...].astype(jnp.float32)

        # --- block path (LN -> LeakyReLU -> Dropout(p=0)=id -> Linear) x2 ---
        h = x
        if use_norm:
            h = _layer_norm_1pass(h,
                                  g1_ref[...].astype(jnp.float32),
                                  be1_ref[...].astype(jnp.float32), eps)
        h = _leaky_relu(h, negative_slope)
        # TODO(synk): stochastic dropout (prng_seed/prng_random_bits) for p > 0
        # (training mode) not implemented; p=0 forward is the identity.
        h = jnp.dot(h.astype(mxu_dtype), w1_ref[...],
                    preferred_element_type=jnp.float32)
        h = h + b1_ref[...].astype(jnp.float32)

        if use_norm:
            h = _layer_norm_1pass(h,
                                  g2_ref[...].astype(jnp.float32),
                                  be2_ref[...].astype(jnp.float32), eps)
        h = _leaky_relu(h, negative_slope)

        # --- second matmul fused with the bypass matmul --------------------
        acc = jnp.dot(h.astype(mxu_dtype), w2_ref[...],
                      preferred_element_type=jnp.float32)
        if has_bypass:
            acc = acc + jnp.dot(x.astype(mxu_dtype), wb_ref[...],
                                preferred_element_type=jnp.float32)
            acc = acc + b2_ref[...].astype(jnp.float32)   # b2 + bb, pre-combined
        else:
            acc = acc + b2_ref[...].astype(jnp.float32) + x   # identity bypass

        o_ref[...] = acc.astype(o_ref.dtype)

    return kernel


# ----------------------------------------------------------------------------- wrapper
def residual_block(x, params, *, tile_m=None, eps=1e-5, negative_slope=0.1,
                   use_norm=True, mxu_dtype=jnp.bfloat16, out_dtype=None):
    """x: (..., feat_in) -> (..., feat_out). Entire residual block in one Pallas call."""
    g1, be1, w1, b1, g2, be2, w2, b2 = params[:8]
    bypass_params = tuple(params[8:])
    has_bypass = len(bypass_params) == 2

    feat_in = x.shape[-1]
    feat_hidden = w1.shape[1]
    feat_out = w2.shape[1]
    assert w1.shape[0] == feat_in and w2.shape[0] == feat_hidden
    if not has_bypass:
        assert feat_in == feat_out, "identity bypass requires feat_in == feat_out"

    lead = x.shape[:-1]
    xf = x.reshape(-1, feat_in)
    m = xf.shape[0]
    out_dtype = x.dtype if out_dtype is None else out_dtype

    # Row-tile selection (no input padding: Pallas masks the partial last block).
    if tile_m is None:
        tile_m = _choose_tile_m(m)
    else:
        tile_m = _round_up(max(8, min(tile_m, _round_up(m, 8))), 8)
    num_tiles = pl.cdiv(m, tile_m)

    # Weight / bias prep (tiny one-time converts, folded by XLA).
    w1k = w1.astype(mxu_dtype)
    w2k = w2.astype(mxu_dtype)
    b2k = b2.astype(jnp.float32)
    if has_bypass:
        wb, bb = bypass_params
        wbk = wb.astype(mxu_dtype)
        b2k = b2k + bb.astype(jnp.float32)   # fuse the two bias adds

    def row_map(i):
        return (i, 0)

    def const_map(i):
        return (0, 0)

    in_specs = [
        pl.BlockSpec((tile_m, feat_in), row_map),          # x rows tile
        pl.BlockSpec((1, feat_in), const_map),             # ln1 gamma
        pl.BlockSpec((1, feat_in), const_map),             # ln1 beta
        pl.BlockSpec((feat_in, feat_hidden), const_map),   # W1 (bf16, resident)
        pl.BlockSpec((1, feat_hidden), const_map),         # b1
        pl.BlockSpec((1, feat_hidden), const_map),         # ln2 gamma
        pl.BlockSpec((1, feat_hidden), const_map),         # ln2 beta
        pl.BlockSpec((feat_hidden, feat_out), const_map),  # W2 (bf16, resident)
        pl.BlockSpec((1, feat_out), const_map),            # b2 (+ bb)
    ]
    args = [xf,
            g1.reshape(1, feat_in), be1.reshape(1, feat_in),
            w1k, b1.reshape(1, feat_hidden),
            g2.reshape(1, feat_hidden), be2.reshape(1, feat_hidden),
            w2k, b2k.reshape(1, feat_out)]
    if has_bypass:
        in_specs.append(pl.BlockSpec((feat_in, feat_out), const_map))   # Wb
        args.append(wbk)

    # Advisory cost estimate for the XLA scheduler.
    flops = 2 * m * (feat_in * feat_hidden + feat_hidden * feat_out)
    if has_bypass:
        flops += 2 * m * feat_in * feat_out
    bytes_accessed = (sum(int(a.size) * a.dtype.itemsize for a in args)
                      + m * feat_out * jnp.dtype(out_dtype).itemsize)
    cost = pl.CostEstimate(flops=int(flops),
                           transcendentals=int(2 * m) if use_norm else 0,
                           bytes_accessed=int(bytes_accessed))

    kernel = _make_kernel(eps=eps, negative_slope=negative_slope,
                          use_norm=use_norm, has_bypass=has_bypass,
                          mxu_dtype=mxu_dtype)

    out = pl.pallas_call(
        kernel,
        out_shape=jax.ShapeDtypeStruct((m, feat_out), out_dtype),
        grid=(num_tiles,),
        in_specs=in_specs,
        out_specs=pl.BlockSpec((tile_m, feat_out), row_map),
        compiler_params=pltpu.CompilerParams(
            dimension_semantics=("parallel",),
            vmem_limit_bytes=32 * 1024 * 1024,   # lift v5e's 16 MiB scoped default
        ),
        cost_estimate=cost,
    )(*args)

    return out.reshape(*lead, feat_out)


# ----------------------------------------------------------------------------- init & reference
def init_params(key, feat_in, feat_hidden, feat_out, dtype=jnp.float32):
    """Init mimicking nn.Linear defaults (U(-1/sqrt(fan_in), 1/sqrt(fan_in))) with slightly
    perturbed LayerNorm affine params so the norm path is exercised.
    Linear weights are stored as (in, out) for the kernel."""
    ks = jax.random.split(key, 10)
    bi = 1.0 / np.sqrt(feat_in)
    bh = 1.0 / np.sqrt(feat_hidden)
    g1 = (1.0 + 0.1 * jax.random.normal(ks[0], (feat_in,))).astype(dtype)
    be1 = (0.05 * jax.random.normal(ks[1], (feat_in,))).astype(dtype)
    w1 = jax.random.uniform(ks[2], (feat_in, feat_hidden), dtype, -bi, bi)
    b1 = jax.random.uniform(ks[3], (feat_hidden,), dtype, -bi, bi)
    g2 = (1.0 + 0.1 * jax.random.normal(ks[4], (feat_hidden,))).astype(dtype)
    be2 = (0.05 * jax.random.normal(ks[5], (feat_hidden,))).astype(dtype)
    w2 = jax.random.uniform(ks[6], (feat_hidden, feat_out), dtype, -bh, bh)
    b2 = jax.random.uniform(ks[7], (feat_out,), dtype, -bh, bh)
    params = [g1, be1, w1, b1, g2, be2, w2, b2]
    if feat_in != feat_out:
        wb = jax.random.uniform(ks[8], (feat_in, feat_out), dtype, -bi, bi)
        bb = jax.random.uniform(ks[9], (feat_out,), dtype, -bi, bi)
        params += [wb, bb]
    return tuple(params)


def reference(x, params, *, eps=1e-5, negative_slope=0.1, use_norm=True,
              mxu_dtype=jnp.bfloat16):
    """Pure-JAX reference matching the PyTorch forward, with matmul operands cast
    to the same MXU dtype as the kernel (f32 accumulation), two-pass LayerNorm."""
    g1, be1, w1, b1, g2, be2, w2, b2 = params[:8]

    def mm(a, w):
        return jnp.dot(a.astype(mxu_dtype), w.astype(mxu_dtype),
                       preferred_element_type=jnp.float32)

    xf = x.astype(jnp.float32)
    h = xf
    if use_norm:
        h = _layer_norm_2pass(h, g1.astype(jnp.float32), be1.astype(jnp.float32), eps)
    h = _leaky_relu(h, negative_slope)
    h = mm(h, w1) + b1.astype(jnp.float32)
    if use_norm:
        h = _layer_norm_2pass(h, g2.astype(jnp.float32), be2.astype(jnp.float32), eps)
    h = _leaky_relu(h, negative_slope)
    h = mm(h, w2) + b2.astype(jnp.float32)
    if len(params) > 8:
        wb, bb = params[8], params[9]
        byp = mm(xf, wb) + bb.astype(jnp.float32)
    else:
        byp = xf
    return (h + byp).astype(x.dtype)


# ----------------------------------------------------------------------------- demo
if __name__ == "__main__":
    # Module defaults: feat_in=128, feat_hidden=256, feat_out=128, drop_out=0.0, use_norm=True.
    B, S = 2, 8
    FEAT_IN, FEAT_HIDDEN, FEAT_OUT = 128, 256, 128

    key = jax.random.PRNGKey(0)
    kx, kp, kx2, kp2, kx3 = jax.random.split(key, 5)

    # 1) Identity-bypass configuration (feat_in == feat_out).
    x = jax.random.normal(kx, (B, S, FEAT_IN), dtype=jnp.float32)
    params = init_params(kp, FEAT_IN, FEAT_HIDDEN, FEAT_OUT)
    out = jax.block_until_ready(residual_block(x, params))
    ref = reference(x, params)
    np.testing.assert_allclose(np.asarray(out), np.asarray(ref), rtol=5e-3, atol=5e-3)

    # 2) Linear-bypass configuration (feat_in != feat_out).
    x2 = jax.random.normal(kx2, (B, S, FEAT_IN), dtype=jnp.float32)
    params2 = init_params(kp2, FEAT_IN, FEAT_HIDDEN, 256)
    out2 = jax.block_until_ready(residual_block(x2, params2))
    ref2 = reference(x2, params2)
    np.testing.assert_allclose(np.asarray(out2), np.asarray(ref2), rtol=5e-3, atol=5e-3)

    # 3) Multi-tile grid with a partial (masked) last row block.
    x3 = jax.random.normal(kx3, (200, FEAT_IN), dtype=jnp.float32)
    out3 = jax.block_until_ready(residual_block(x3, params, tile_m=64))
    ref3 = reference(x3, params)
    np.testing.assert_allclose(np.asarray(out3), np.asarray(ref3), rtol=5e-3, atol=5e-3)

    print("KERNEL_OK")
</pallas_src>

<mosaic_0001>
module attributes {stable_mosaic.version = 11 : i64} {
  func.func @kernel(%arg0: i32, %arg1: memref<16x128xf32, #tpu.memory_space<vmem>>, %arg2: memref<1x128xf32, #tpu.memory_space<vmem>>, %arg3: memref<1x128xf32, #tpu.memory_space<vmem>>, %arg4: memref<128x256xbf16, #tpu.memory_space<vmem>>, %arg5: memref<1x256xf32, #tpu.memory_space<vmem>>, %arg6: memref<1x256xf32, #tpu.memory_space<vmem>>, %arg7: memref<1x256xf32, #tpu.memory_space<vmem>>, %arg8: memref<256x128xbf16, #tpu.memory_space<vmem>>, %arg9: memref<1x128xf32, #tpu.memory_space<vmem>>, %arg10: memref<16x128xf32, #tpu.memory_space<vmem>>) attributes {dimension_semantics = [#tpu.dimension_semantics<parallel>], iteration_bounds = array<i64: 1>, scalar_prefetch = 0 : i64, scratch_operands = 0 : i64, tpu.core_type = #tpu.core_type<tc>, window_params = [{transform_indices = @transform_0, window_bounds = array<i64: 16, 128>}, {pipeline_mode = #tpu.pipeline_mode<synchronous>, transform_indices = @transform_1, window_bounds = array<i64: 1, 128>}, {pipeline_mode = #tpu.pipeline_mode<synchronous>, transform_indices = @transform_2, window_bounds = array<i64: 1, 128>}, {pipeline_mode = #tpu.pipeline_mode<synchronous>, transform_indices = @transform_3, window_bounds = array<i64: 128, 256>}, {pipeline_mode = #tpu.pipeline_mode<synchronous>, transform_indices = @transform_4, window_bounds = array<i64: 1, 256>}, {pipeline_mode = #tpu.pipeline_mode<synchronous>, transform_indices = @transform_5, window_bounds = array<i64: 1, 256>}, {pipeline_mode = #tpu.pipeline_mode<synchronous>, transform_indices = @transform_6, window_bounds = array<i64: 1, 256>}, {pipeline_mode = #tpu.pipeline_mode<synchronous>, transform_indices = @transform_7, window_bounds = array<i64: 256, 128>}, {pipeline_mode = #tpu.pipeline_mode<synchronous>, transform_indices = @transform_8, window_bounds = array<i64: 1, 128>}, {transform_indices = @transform_9, window_bounds = array<i64: 16, 128>}]} {
    %c0 = arith.constant 0 : index
    %c0_0 = arith.constant 0 : index
    %0 = vector.load %arg1[%c0, %c0_0] : memref<16x128xf32, #tpu.memory_space<vmem>>, vector<16x128xf32>
    %c0_1 = arith.constant 0 : index
    %c0_2 = arith.constant 0 : index
    %1 = vector.load %arg2[%c0_1, %c0_2] : memref<1x128xf32, #tpu.memory_space<vmem>>, vector<1x128xf32>
    %c0_3 = arith.constant 0 : index
    %c0_4 = arith.constant 0 : index
    %2 = vector.load %arg3[%c0_3, %c0_4] : memref<1x128xf32, #tpu.memory_space<vmem>>, vector<1x128xf32>
    %cst = arith.constant dense<0.000000e+00> : vector<16xf32>
    %3 = vector.multi_reduction <add>, %0, %cst [1] : vector<16x128xf32> to vector<16xf32>
    %4 = vector.shape_cast %3 : vector<16xf32> to vector<16x1xf32>
    %cst_5 = arith.constant 1.280000e+02 : f32
    %5 = vector.broadcast %cst_5 : f32 to vector<16x1xf32>
    %6 = arith.divf %4, %5 : vector<16x1xf32>
    %7 = arith.mulf %0, %0 : vector<16x128xf32>
    %cst_6 = arith.constant dense<0.000000e+00> : vector<16xf32>
    %8 = vector.multi_reduction <add>, %7, %cst_6 [1] : vector<16x128xf32> to vector<16xf32>
    %9 = vector.shape_cast %8 : vector<16xf32> to vector<16x1xf32>
    %cst_7 = arith.constant 1.280000e+02 : f32
    %10 = vector.broadcast %cst_7 : f32 to vector<16x1xf32>
    %11 = arith.divf %9, %10 : vector<16x1xf32>
    %12 = arith.mulf %6, %6 : vector<16x1xf32>
    %13 = arith.subf %11, %12 : vector<16x1xf32>
    %14 = vector.broadcast %6 : vector<16x1xf32> to vector<16x128xf32>
    %15 = arith.subf %0, %14 : vector<16x128xf32>
    %cst_8 = arith.constant 9.99999974E-6 : f32
    %16 = vector.broadcast %cst_8 : f32 to vector<16x1xf32>
    %17 = arith.addf %13, %16 : vector<16x1xf32>
    %18 = math.rsqrt %17 : vector<16x1xf32>
    %19 = vector.broadcast %18 : vector<16x1xf32> to vector<16x128xf32>
    %20 = arith.mulf %15, %19 : vector<16x128xf32>
    %21 = vector.broadcast %1 : vector<1x128xf32> to vector<16x128xf32>
    %22 = arith.mulf %20, %21 : vector<16x128xf32>
    %23 = vector.broadcast %2 : vector<1x128xf32> to vector<16x128xf32>
    %24 = arith.addf %22, %23 : vector<16x128xf32>
    %cst_9 = arith.constant 0.000000e+00 : f32
    %25 = vector.broadcast %cst_9 : f32 to vector<16x128xf32>
    %26 = arith.cmpf oge, %24, %25 : vector<16x128xf32>
    %cst_10 = arith.constant 1.000000e-01 : f32
    %27 = vector.broadcast %cst_10 : f32 to vector<16x128xf32>
    %28 = arith.mulf %27, %24 : vector<16x128xf32>
    %29 = arith.select %26, %24, %28 : vector<16x128xi1>, vector<16x128xf32>
    %30 = arith.truncf %29 : vector<16x128xf32> to vector<16x128xbf16>
    %c0_11 = arith.constant 0 : index
    %c0_12 = arith.constant 0 : index
    %31 = vector.load %arg4[%c0_11, %c0_12] : memref<128x256xbf16, #tpu.memory_space<vmem>>, vector<128x256xbf16>
    %cst_13 = arith.constant dense<0.000000e+00> : vector<16x256xf32>
    %32 = tpu.matmul %30, %31, %cst_13 {dimension_numbers = #tpu.dot_dimension_numbers<[1], [0], [0], [1], [0, 0, 1, 1], [], []>} : vector<16x128xbf16>, vector<128x256xbf16>, vector<16x256xf32> -> vector<16x256xf32>
    %c0_14 = arith.constant 0 : index
    %c0_15 = arith.constant 0 : index
    %33 = vector.load %arg5[%c0_14, %c0_15] : memref<1x256xf32, #tpu.memory_space<vmem>>, vector<1x256xf32>
    %34 = vector.broadcast %33 : vector<1x256xf32> to vector<16x256xf32>
    %35 = arith.addf %32, %34 : vector<16x256xf32>
    %c0_16 = arith.constant 0 : index
    %c0_17 = arith.constant 0 : index
    %36 = vector.load %arg6[%c0_16, %c0_17] : memref<1x256xf32, #tpu.memory_space<vmem>>, vector<1x256xf32>
    %c0_18 = arith.constant 0 : index
    %c0_19 = arith.constant 0 : index
    %37 = vector.load %arg7[%c0_18, %c0_19] : memref<1x256xf32, #tpu.memory_space<vmem>>, vector<1x256xf32>
    %cst_20 = arith.constant dense<0.000000e+00> : vector<16xf32>
    %38 = vector.multi_reduction <add>, %35, %cst_20 [1] : vector<16x256xf32> to vector<16xf32>
    %39 = vector.shape_cast %38 : vector<16xf32> to vector<16x1xf32>
    %cst_21 = arith.constant 2.560000e+02 : f32
    %40 = vector.broadcast %cst_21 : f32 to vector<16x1xf32>
    %41 = arith.divf %39, %40 : vector<16x1xf32>
    %42 = arith.mulf %35, %35 : vector<16x256xf32>
    %cst_22 = arith.constant dense<0.000000e+00> : vector<16xf32>
    %43 = vector.multi_reduction <add>, %42, %cst_22 [1] : vector<16x256xf32> to vector<16xf32>
    %44 = vector.shape_cast %43 : vector<16xf32> to vector<16x1xf32>
    %cst_23 = arith.constant 2.560000e+02 : f32
    %45 = vector.broadcast %cst_23 : f32 to vector<16x1xf32>
    %46 = arith.divf %44, %45 : vector<16x1xf32>
    %47 = arith.mulf %41, %41 : vector<16x1xf32>
    %48 = arith.subf %46, %47 : vector<16x1xf32>
    %49 = vector.broadcast %41 : vector<16x1xf32> to vector<16x256xf32>
    %50 = arith.subf %35, %49 : vector<16x256xf32>
    %cst_24 = arith.constant 9.99999974E-6 : f32
    %51 = vector.broadcast %cst_24 : f32 to vector<16x1xf32>
    %52 = arith.addf %48, %51 : vector<16x1xf32>
    %53 = math.rsqrt %52 : vector<16x1xf32>
    %54 = vector.broadcast %53 : vector<16x1xf32> to vector<16x256xf32>
    %55 = arith.mulf %50, %54 : vector<16x256xf32>
    %56 = vector.broadcast %36 : vector<1x256xf32> to vector<16x256xf32>
    %57 = arith.mulf %55, %56 : vector<16x256xf32>
    %58 = vector.broadcast %37 : vector<1x256xf32> to vector<16x256xf32>
    %59 = arith.addf %57, %58 : vector<16x256xf32>
    %cst_25 = arith.constant 0.000000e+00 : f32
    %60 = vector.broadcast %cst_25 : f32 to vector<16x256xf32>
    %61 = arith.cmpf oge, %59, %60 : vector<16x256xf32>
    %cst_26 = arith.constant 1.000000e-01 : f32
    %62 = vector.broadcast %cst_26 : f32 to vector<16x256xf32>
    %63 = arith.mulf %62, %59 : vector<16x256xf32>
    %64 = arith.select %61, %59, %63 : vector<16x256xi1>, vector<16x256xf32>
    %65 = arith.truncf %64 : vector<16x256xf32> to vector<16x256xbf16>
    %c0_27 = arith.constant 0 : index
    %c0_28 = arith.constant 0 : index
    %66 = vector.load %arg8[%c0_27, %c0_28] : memref<256x128xbf16, #tpu.memory_space<vmem>>, vector<256x128xbf16>
    %cst_29 = arith.constant dense<0.000000e+00> : vector<16x128xf32>
    %67 = tpu.matmul %65, %66, %cst_29 {dimension_numbers = #tpu.dot_dimension_numbers<[1], [0], [0], [1], [0, 0, 1, 1], [], []>} : vector<16x256xbf16>, vector<256x128xbf16>, vector<16x128xf32> -> vector<16x128xf32>
    %c0_30 = arith.constant 0 : index
    %c0_31 = arith.constant 0 : index
    %68 = vector.load %arg9[%c0_30, %c0_31] : memref<1x128xf32, #tpu.memory_space<vmem>>, vector<1x128xf32>
    %69 = vector.broadcast %68 : vector<1x128xf32> to vector<16x128xf32>
    %70 = arith.addf %67, %69 : vector<16x128xf32>
    %71 = arith.addf %70, %0 : vector<16x128xf32>
    %c0_32 = arith.constant 0 : index
    %c0_33 = arith.constant 0 : index
    %72 = vector.load %arg10[%c0_32, %c0_33] : memref<16x128xf32, #tpu.memory_space<vmem>>, vector<16x128xf32>
    tpu.vector_store %arg10[%c0_32, %c0_33], %71 {strides = array<i32>} : memref<16x128xf32, #tpu.memory_space<vmem>>, vector<16x128xf32>,
    return
  }
  func.func @transform_0(%arg0: i32) -> (i32, i32) {
    %c0_i32 = arith.constant 0 : i32
    %c0_i32_0 = arith.constant 0 : i32
    return %arg0, %c0_i32 : i32, i32
  }
  func.func @transform_1(%arg0: i32) -> (i32, i32) {
    %c0_i32 = arith.constant 0 : i32
    %c0_i32_0 = arith.constant 0 : i32
    %c0_i32_1 = arith.constant 0 : i32
    return %c0_i32, %c0_i32_0 : i32, i32
  }
  func.func @transform_2(%arg0: i32) -> (i32, i32) {
    %c0_i32 = arith.constant 0 : i32
    %c0_i32_0 = arith.constant 0 : i32
    %c0_i32_1 = arith.constant 0 : i32
    return %c0_i32, %c0_i32_0 : i32, i32
  }
  func.func @transform_3(%arg0: i32) -> (i32, i32) {
    %c0_i32 = arith.constant 0 : i32
    %c0_i32_0 = arith.constant 0 : i32
    %c0_i32_1 = arith.constant 0 : i32
    return %c0_i32, %c0_i32_0 : i32, i32
  }
  func.func @transform_4(%arg0: i32) -> (i32, i32) {
    %c0_i32 = arith.constant 0 : i32
    %c0_i32_0 = arith.constant 0 : i32
    %c0_i32_1 = arith.constant 0 : i32
    return %c0_i32, %c0_i32_0 : i32, i32
  }
  func.func @transform_5(%arg0: i32) -> (i32, i32) {
    %c0_i32 = arith.constant 0 : i32
    %c0_i32_0 = arith.constant 0 : i32
    %c0_i32_1 = arith.constant 0 : i32
    return %c0_i32, %c0_i32_0 : i32, i32
  }
  func.func @transform_6(%arg0: i32) -> (i32, i32) {
    %c0_i32 = arith.constant 0 : i32
    %c0_i32_0 = arith.constant 0 : i32
    %c0_i32_1 = arith.constant 0 : i32
    return %c0_i32, %c0_i32_0 : i32, i32
  }
  func.func @transform_7(%arg0: i32) -> (i32, i32) {
    %c0_i32 = arith.constant 0 : i32
    %c0_i32_0 = arith.constant 0 : i32
    %c0_i32_1 = arith.constant 0 : i32
    return %c0_i32, %c0_i32_0 : i32, i32
  }
  func.func @transform_8(%arg0: i32) -> (i32, i32) {
    %c0_i32 = arith.constant 0 : i32
    %c0_i32_0 = arith.constant 0 : i32
    %c0_i32_1 = arith.constant 0 : i32
    return %c0_i32, %c0_i32_0 : i32, i32
  }
  func.func @transform_9(%arg0: i32) -> (i32, i32) {
    %c0_i32 = arith.constant 0 : i32
    %c0_i32_0 = arith.constant 0 : i32
    return %arg0, %c0_i32 : i32, i32
  }
}

</mosaic_0001>

<bundles_post_ra>
// kernel: tpu_custom_call.1
= control target key start
LH: loop header
LB: loop body
LE: loop exit
PB: predicated region body
PF: predicated region fallthrough
CT: control target
= control target key end

     0   :  { %14 = vsyncpa [#allocation3], 0  ;;  %s944_s0 = inlined_call_operand.hbm [shape: f32[16,128], index: 0, kind: input, shape index: {}]   ;;  %s945_s1 = inlined_call_operand.vmem [shape: f32[1,128], index: 1, kind: input, shape index: {}]   ;;  %s946_s2 = inlined_call_operand.hbm [shape: f32[1,128], index: 2, kind: input, shape index: {}]   ;;  %s947_s3 = inlined_call_operand.hbm [shape: bf16[128,256], index: 3, kind: input, shape index: {}]   ;;  %s948_s4 = inlined_call_operand.vmem [shape: f32[1,256], index: 4, kind: input, shape index: {}]   ;;  %s949_s5 = inlined_call_operand.vmem [shape: f32[1,256], index: 5, kind: input, shape index: {}]   ;;  %s950_s6 = inlined_call_operand.vmem [shape: f32[1,256], index: 6, kind: input, shape index: {}]   ;;  %s951_s7 = inlined_call_operand.hbm [shape: bf16[256,128], index: 7, kind: input, shape index: {}]   ;;  %s952_s8 = inlined_call_operand.vmem [shape: f32[1,128], index: 8, kind: input, shape index: {}]   ;;  %s953_s9 = inlined_call_operand.hbm [shape: f32[16,128], index: 9, kind: output, shape index: {}]  }
   0x1   :  { %15 = vsyncpa [#allocation6], 0 }
   0x2   :  { %16 = vsyncpa [#allocation9], 0 }
   0x3   :  { %17 = vsyncpa [#allocation4], 0  ;;  %s797_s30 = smov [#allocation5]   ;;  %s798_s11 = smov [#allocation2]  }
   0x4   :  { %s38_s10 = sshll.u32 %s797_s30, 4  ;;  %s23_s12 = sshll.u32 %s798_s11, 4  ;;  %s39_s10 = int_to_ptr.vmem [resolvable:$true] %s38_s10  ;;  %s24_s12 = int_to_ptr.vmem [resolvable:$true] %s23_s12 }
   0x5   :  { %s697_s13 = scalar_lea.vmem %s39_s10, 16  ;;  %s701_s14 = scalar_lea.vmem %s39_s10, 32 }
   0x6   :  { %p698_p0 = scmp.ne.s32.totalorder %s39_s10, %s697_s13  ;;  %p702_p1 = scmp.lt.s32.totalorder %s39_s10, %s39_s10 }
   0x7   :  { %p703_p2 = scmp.lt.s32.totalorder %s701_s14, %s697_s13 }
   0x9   :  { %p704_p3 = por %p703_p2, %p702_p1 }
   0xb   :  { %p705_p4 = pnand %p704_p3, %p698_p0 }
   0xd   :  { %708 = shalt.err (!%p705_p4)
}
   0xe   :  { %41 = dma.hbm_to_vmem [thread:$0]  %s946_s2, 16, %s39_s10, [#allocation6]  }
   0xf   :  { %s717_s17 = scalar_lea.vmem %s24_s12, 256  ;;  %p722_p6 = scmp.lt.s32.totalorder %s24_s12, %s24_s12 }
  0x10   :  { %p718_p5 = scmp.ne.s32.totalorder %s24_s12, %s717_s17  ;;  %p723_p7 = scmp.lt.s32.totalorder %s717_s17, %s717_s17 }
  0x12   :  { %p724_p8 = por %p723_p7, %p722_p6 }
  0x14   :  { %p725_p9 = pnand %p724_p8, %p718_p5 }
  0x16   :  { %728 = shalt.err (!%p725_p9)
}
  0x17   :  { %s799_s18 = smov 128   ;;  %s800_s19 = smov 8  }
  0x18   :  { %29 = dma.hbm_to_vmem [thread:$0]  %s944_s0, 256, %s24_s12, [#allocation3], %s799_s18, %s799_s18, %s800_s19  }
  0x19   :  { %s801_s22 = smov [#allocation7]   ;;  %s802_s24 = smov [#allocation8]  }
  0x1a   :  { %s47_s23 = sshll.u32 %s801_s22, 4  ;;  %s65_s2 = sshll.u32 %s802_s24, 4  ;;  %s48_s23 = int_to_ptr.vmem [resolvable:$true] %s47_s23  ;;  %s66_s2 = int_to_ptr.vmem [resolvable:$true] %s65_s2 }
  0x1b   :  { %s737_s25 = scalar_lea.vmem %s48_s23, 2048  ;;  %p742_p11 = scmp.lt.s32.totalorder %s48_s23, %s48_s23 }
  0x1c   :  { %p738_p10 = scmp.ne.s32.totalorder %s48_s23, %s737_s25  ;;  %p743_p12 = scmp.lt.s32.totalorder %s737_s25, %s737_s25 }
  0x1e   :  { %p744_p13 = por %p743_p12, %p742_p11 }
  0x20   :  { %p745_p0 = pnand %p744_p13, %p738_p10 }
  0x22   :  { %748 = shalt.err (!%p745_p0)
}
  0x23   :  { %53 = dma.hbm_to_vmem [thread:$0]  %s947_s3, 2048, %s48_s23, [#allocation6], %s799_s18, %s799_s18, %s800_s19  }
  0x24   :  { %s757_s0 = scalar_lea.vmem %s66_s2, 2048  ;;  %p762_p2 = scmp.lt.s32.totalorder %s66_s2, %s66_s2 }
  0x25   :  { %p758_p1 = scmp.ne.s32.totalorder %s66_s2, %s757_s0  ;;  %p763_p3 = scmp.lt.s32.totalorder %s757_s0, %s757_s0 }
  0x27   :  { %p764_p4 = por %p763_p3, %p762_p2 }
  0x29   :  { %p765_p5 = pnand %p764_p4, %p758_p1 }
  0x2b   :  { %768 = shalt.err (!%p765_p5)
}
  0x2c   :  { %s803_s28 = smov 64   ;;  %s804_s29 = smov 4  }
  0x2d   :  { %71 = dma.hbm_to_vmem [thread:$0]  %s951_s7, 2048, %s66_s2, [#allocation9], %s803_s28, %s803_s28, %s804_s29  }
  0x2e   :  { %789 = dma.done.wait [#allocation3], 256  }
  0x2f   :  { %790 = vsyncadd [#allocation3], 4294967040 }
  0x30   :  { %791 = dma.done.wait [#allocation6], 2064  }
  0x31   :  { %792 = vsyncadd [#allocation6], 4294965232 }
  0x32   :  { %793 = dma.done.wait [#allocation9], 2048  }
  0x33   :  { %794 = vsyncadd [#allocation9], 4294965248  ;;  %v875_v0 = vld [vmem:[#allocation2] sm:$0xff]  ;;  %v877_v1 = vld [vmem:[#allocation2 + $0x8] sm:$0xff]  ;;  %v805_v13 = vmov 0   ;;  %v159_v52 = vlaneseq  ;;  %s806_s15 = smov [#allocation10]  }
  0x34   :  { %91 = vadd.xlane.f32.xlu0 %v875_v0  ;;  %v98_v2 = vmul.f32 %v875_v0, %v875_v0  ;;  %v99_v3 = vmul.f32 %v877_v1, %v877_v1  ;;  %v641_v4 = vld [vmem:[#allocation7 + $0x74] ss:$8 sps:$4 sm:$0xff]   ;;  %v643_v5 = vld [vmem:[#allocation7 + $0x70] ss:$8 sps:$4 sm:$0xff]   ;;  %v644_v6 = vld [vmem:[#allocation7 + $0x64] ss:$8 sps:$4 sm:$0xff]   ;;  %281 = vmatprep.mubr.bf16.mxu0 %v805_v13 }
  0x35   :  { %249 = vmatprep.subr.bf16.mxu0 %v641_v4  ;;  %v646_v7 = vld [vmem:[#allocation7 + $0x60] ss:$8 sps:$4 sm:$0xff]   ;;  %v647_v8 = vld [vmem:[#allocation7 + $0x54] ss:$8 sps:$4 sm:$0xff]   ;;  %v649_v9 = vld [vmem:[#allocation7 + $0x50] ss:$8 sps:$4 sm:$0xff]  }
  0x36   :  { %100 = vadd.xlane.f32.xlu1 %v98_v2  ;;  %250 = vmatpush1.bf16.msra.mxu0 %v643_v5  ;;  %v650_v10 = vld [vmem:[#allocation7 + $0x44] ss:$8 sps:$4 sm:$0xff]   ;;  %v652_v11 = vld [vmem:[#allocation7 + $0x40] ss:$8 sps:$4 sm:$0xff]   ;;  %v653_v12 = vld [vmem:[#allocation7 + $0x34] ss:$8 sps:$4 sm:$0xff]  }
  0x37   :  { %251 = vmatprep.subr.bf16.mxu0 %v644_v6  ;;  %v655_v14 = vld [vmem:[#allocation7 + $0x30] ss:$8 sps:$4 sm:$0xff]   ;;  %v656_v15 = vld [vmem:[#allocation7 + $0x24] ss:$8 sps:$4 sm:$0xff]   ;;  %v658_v16 = vld [vmem:[#allocation7 + $0x20] ss:$8 sps:$4 sm:$0xff]  }
  0x38   :  { %93 = vadd.xlane.f32.xlu0 %v877_v1  ;;  %v659_v17 = vld [vmem:[#allocation7 + $0x14] ss:$8 sps:$4 sm:$0xff]   ;;  %v661_v18 = vld [vmem:[#allocation7 + $0x10] ss:$8 sps:$4 sm:$0xff]   ;;  %v662_v19 = vld [vmem:[#allocation7 + $0x4] ss:$8 sps:$4 sm:$0xff]  }
  0x39   :  { %v664_v20 = vld [vmem:[#allocation7] ss:$8 sps:$4 sm:$0xff]   ;;  %v574_v37 = vld [vmem:[%s945_s1] ss:$0 sm:$0xff]  ;;  %v575_v39 = vld [vmem:[#allocation5] ss:$0 sm:$0xff] }
  0x3a   :  { %102 = vadd.xlane.f32.xlu1 %v99_v3  ;;  %252 = vmatpush1.bf16.msra.mxu0 %v646_v7  ;;  %v160_v53 = vshrl.u32 %v159_v52, 7  ;;  %v157_v56 = vld [vmem:[%s948_s4] sm:$0x3]  ;;  %v665_v13 = vld [vmem:[#allocation8 + $0x78] sm:$0xff]   ;;  %s560_s16 = sshll.u32 %s806_s15, 4  ;;  %s561_s16 = int_to_ptr.vmem [resolvable:$true] %s560_s16 }
  0x3b   :  { %253 = vmatprep.subr.bf16.mxu0 %v647_v8  ;;  %609 = vmatprep.subr.bf16.mxu1 %v665_v13  ;;  %s769_s17 = scalar_lea.vmem %s561_s16, 256  ;;  %p774_p7 = scmp.lt.s32.totalorder %s561_s16, %s561_s16 }
  0x3c   :  { %v890_v54 = vsub.s32 0, %v160_v53  ;;  %v892_v55 = vsub.s32 1, %v160_v53  ;;  %p770_p6 = scmp.ne.s32.totalorder %s561_s16, %s769_s17  ;;  %p775_p8 = scmp.lt.s32.totalorder %s769_s17, %s769_s17 }
  0x3e   :  { %254 = vmatpush1.bf16.msra.mxu0 %v649_v9  ;;  %v162_v57 = vrot.slane %v157_v56, %v890_v54  ;;  %v166_v58 = vrot.slane %v157_v56, %v892_v55  ;;  %p776_p9 = por %p775_p8, %p774_p7 }
  0x3f   :  { %255 = vmatprep.subr.bf16.mxu0 %v650_v10 }
  0x40   :  { %p777_p10 = pnand %p776_p9, %p770_p6 }
  0x42   :  { %256 = vmatpush1.bf16.msra.mxu0 %v652_v11 }
  0x43   :  { %257 = vmatprep.subr.bf16.mxu0 %v653_v12 }
  0x46   :  { %258 = vmatpush1.bf16.msra.mxu0 %v655_v14  ;;  %v666_v14 = vld [vmem:[#allocation8 + $0x38] sm:$0xff]  }
  0x47   :  { %259 = vmatprep.subr.bf16.mxu0 %v656_v15  ;;  %610 = vmatpush3.bf16.msra.mxu1 %v666_v14  ;;  %v667_v15 = vld [vmem:[#allocation8 + $0x70] sm:$0xff]  }
  0x48   :  { %611 = vmatprep.subr.bf16.mxu1 %v667_v15 }
  0x4a   :  { %260 = vmatpush1.bf16.msra.mxu0 %v658_v16  ;;  %v668_v16 = vld [vmem:[#allocation8 + $0x30] sm:$0xff]  }
  0x4b   :  { %261 = vmatprep.subr.bf16.mxu0 %v659_v17  ;;  %612 = vmatpush3.bf16.msra.mxu1 %v668_v16  ;;  %v669_v17 = vld [vmem:[#allocation8 + $0x68] sm:$0xff]  }
  0x4c   :  { %613 = vmatprep.subr.bf16.mxu1 %v669_v17  ;;  %v592_v16 = vld [vmem:[%s952_s8] ss:$0 sm:$0xff] }
  0x4e   :  { %262 = vmatpush1.bf16.msra.mxu0 %v661_v18  ;;  %v670_v18 = vld [vmem:[#allocation8 + $0x28] sm:$0xff]  }
  0x4f   :  { %263 = vmatprep.subr.bf16.mxu0 %v662_v19  ;;  %v671_v19 = vld [vmem:[#allocation8 + $0x60] sm:$0xff]   ;;  %614 = vmatpush3.bf16.msra.mxu1 %v670_v18 }
  0x50   :  { %615 = vmatprep.subr.bf16.mxu1 %v671_v19 }
  0x52   :  { %264 = vmatpush1.bf16.msra.mxu0 %v664_v20  ;;  %v672_v20 = vld [vmem:[#allocation8 + $0x20] sm:$0xff]  }
  0x53   :  { %616 = vmatpush3.bf16.msra.mxu1 %v672_v20 }
  0xbd   :  { %v92_v21 = vpop.xlane.xlu0 %91 }
  0xbe   :  { %v96_v22 = vmul.f32 0.0078125, %v92_v21  ;;  %v673_v21 = vld [vmem:[#allocation8 + $0x58] sm:$0xff]  }
  0xbf   :  { %v101_v23 = vpop.xlane.xlu1 %100  ;;  %617 = vmatprep.subr.bf16.mxu1 %v673_v21 }
  0xc0   :  { %v106_v24 = vmul.f32 %v96_v22, %v96_v22  ;;  %v104_v25 = vmul.f32 0.0078125, %v101_v23  ;;  %v110_v35 = vsub.f32 %v875_v0, %v96_v22  ;;  %v674_v22 = vld [vmem:[#allocation8 + $0x18] sm:$0xff]   ;;  %v675_v23 = vld [vmem:[#allocation8 + $0x50] sm:$0xff]  }
  0xc1   :  { %v94_v26 = vpop.xlane.xlu0 %93  ;;  %618 = vmatpush3.bf16.msra.mxu1 %v674_v22 }
  0xc2   :  { %v108_v27 = vsub.f32 %v104_v25, %v106_v24  ;;  %v97_v28 = vmul.f32 0.0078125, %v94_v26  ;;  %v676_v24 = vld [vmem:[#allocation8 + $0x10] sm:$0xff]   ;;  %619 = vmatprep.subr.bf16.mxu1 %v675_v23  ;;  %v677_v25 = vld [vmem:[#allocation8 + $0x48] sm:$0xff]  }
  0xc3   :  { %v103_v29 = vpop.xlane.xlu1 %102  ;;  %v678_v26 = vld [vmem:[#allocation8 + $0x8] sm:$0xff]  }
  0xc4   :  { %v112_v30 = vadd.f32 1e-05, %v108_v27  ;;  %v107_v31 = vmul.f32 %v97_v28, %v97_v28  ;;  %v105_v32 = vmul.f32 0.0078125, %v103_v29  ;;  %v111_v40 = vsub.f32 %v877_v1, %v97_v28  ;;  %v679_v27 = vld [vmem:[#allocation8 + $0x40] sm:$0xff]  }
  0xc5   :  { %620 = vmatpush3.bf16.msra.mxu1 %v676_v24  ;;  %v680_v28 = vld [vmem:[#allocation8] sm:$0xff]  }
  0xc6   :  { %681 = vrsqrt.f32 %v112_v30  ;;  %v109_v33 = vsub.f32 %v105_v32, %v107_v31  ;;  %621 = vmatprep.subr.bf16.mxu1 %v677_v25 }
  0xc8   :  { %v113_v34 = vadd.f32 1e-05, %v109_v33 }
  0xc9   :  { %622 = vmatpush3.bf16.msra.mxu1 %v678_v26 }
  0xca   :  { %683 = vrsqrt.f32 %v113_v34  ;;  %623 = vmatprep.subr.bf16.mxu1 %v679_v27 }
  0xcd   :  { %624 = vmatpush3.bf16.msra.mxu1 %v680_v28 }
  0xd3   :  { %v682_v36 = vpop.eup %681 }
  0xd4   :  { %v116_v38 = vmul.f32 %v682_v36, %v110_v35 }
  0xd6   :  { %v124_v41 = vmul.f32 %v574_v37, %v116_v38 }
  0xd7   :  { %v684_v42 = vpop.eup %683 }
  0xd8   :  { %v117_v43 = vmul.f32 %v684_v42, %v111_v40  ;;  %v132_v44 = vadd.f32 %v575_v39, %v124_v41 }
  0xda   :  { %v125_v45 = vmul.f32 %v574_v37, %v117_v43  ;;  %v136_v47 = vmul.f32 0.1, %v132_v44  ;;  %vm134_vm0 = vcmp.ge.f32.partialorder %v132_v44, 0.0  ;;  %v292_v43 = vld [vmem:[%s949_s5] sm:$0x3] }
  0xdc   :  { %v133_v46 = vadd.f32 %v575_v39, %v125_v45  ;;  %v138_v49 = vsel %vm134_vm0, %v132_v44, %v136_v47  ;;  %v293_v44 = vld [vmem:[%s950_s6] sm:$0x3]  ;;  %v335_v47 = vrot.slane %v292_v43, %v890_v54 }
  0xdd   :  { %v354_v52 = vrot.slane %v293_v44, %v892_v55 }
  0xde   :  { %vm135_vm1 = vcmp.ge.f32.partialorder %v133_v46, 0.0  ;;  %v137_v48 = vmul.f32 0.1, %v133_v46 }
  0xe0   :  { %v139_v50 = vsel %vm135_vm1, %v133_v46, %v137_v48  ;;  %v339_v48 = vrot.slane %v292_v43, %v892_v55 }
  0xe1   :  { %v140_v51 = vpack.c.bf16 %v139_v50, %v138_v49 }
  0xe3   :  { %282 = vmatmul.mubr.bf16.vlgmr.msra.gmra.mxu0 %v140_v51  ;;  %v350_v51 = vrot.slane %v293_v44, %v890_v54 }
 0x1a3   :  { %v283_v59 = vpop.f32.mrf.mxu0 }
 0x1a4   :  { %v899_v61 = vadd.f32 %v283_v59, %v162_v57 }
 0x1a5   :  { %v285_v60 = vpop.f32.mrf.mxu0 }
 0x1a6   :  { %v901_v62 = vadd.f32 %v285_v60, %v166_v58  ;;  %v303_v7 = vmul.f32 %v899_v61, %v899_v61 }
 0x1a7   :  { %v287_v63 = vpop.f32.mrf.mxu0 }
 0x1a8   :  { %v294_v2 = vadd.f32 %v901_v62, %v899_v61  ;;  %v304_v3 = vmul.f32 %v901_v62, %v901_v62  ;;  %v907_v5 = vadd.f32 %v287_v63, %v162_v57 }
 0x1a9   :  { %v289_v4 = vpop.f32.mrf.mxu0 }
 0x1aa   :  { %v909_v6 = vadd.f32 %v289_v4, %v166_v58  ;;  %295 = vadd.xlane.f32.xlu0 %v294_v2  ;;  %v307_v9 = vadd.f32 %v304_v3, %v303_v7  ;;  %v305_v11 = vmul.f32 %v907_v5, %v907_v5 }
 0x1ac   :  { %v297_v8 = vadd.f32 %v909_v6, %v907_v5  ;;  %v306_v10 = vmul.f32 %v909_v6, %v909_v6 }
 0x1ae   :  { %298 = vadd.xlane.f32.xlu1 %v297_v8  ;;  %308 = vadd.xlane.f32.xlu0 %v307_v9  ;;  %v310_v12 = vadd.f32 %v306_v10, %v305_v11 }
 0x1b2   :  { %311 = vadd.xlane.f32.xlu1 %v310_v12 }
 0x233   :  { %v296_v29 = vpop.xlane.xlu0 %295 }
 0x234   :  { %v301_v30 = vmul.f32 0.00390625, %v296_v29 }
 0x236   :  { %v315_v34 = vmul.f32 %v301_v30, %v301_v30  ;;  %v319_v45 = vsub.f32 %v899_v61, %v301_v30  ;;  %v320_v46 = vsub.f32 %v901_v62, %v301_v30 }
 0x237   :  { %v299_v31 = vpop.xlane.xlu1 %298  ;;  %v309_v32 = vpop.xlane.xlu0 %308 }
 0x238   :  { %v302_v33 = vmul.f32 0.00390625, %v299_v31  ;;  %v313_v35 = vmul.f32 0.00390625, %v309_v32 }
 0x23a   :  { %v317_v36 = vsub.f32 %v313_v35, %v315_v34  ;;  %v316_v39 = vmul.f32 %v302_v33, %v302_v33  ;;  %v321_v56 = vsub.f32 %v907_v5, %v302_v33  ;;  %v322_v57 = vsub.f32 %v909_v6, %v302_v33 }
 0x23b   :  { %v312_v37 = vpop.xlane.xlu1 %311 }
 0x23c   :  { %v323_v38 = vadd.f32 1e-05, %v317_v36  ;;  %v314_v40 = vmul.f32 0.00390625, %v312_v37 }
 0x23e   :  { %685 = vrsqrt.f32 %v323_v38  ;;  %v318_v41 = vsub.f32 %v314_v40, %v316_v39 }
 0x240   :  { %v324_v42 = vadd.f32 1e-05, %v318_v41 }
 0x242   :  { %687 = vrsqrt.f32 %v324_v42 }
 0x24b   :  { %v686_v49 = vpop.eup %685 }
 0x24c   :  { %v328_v50 = vmul.f32 %v686_v49, %v320_v46  ;;  %v327_v53 = vmul.f32 %v686_v49, %v319_v45 }
 0x24e   :  { %v343_v58 = vmul.f32 %v339_v48, %v328_v50  ;;  %v342_v59 = vmul.f32 %v335_v47, %v327_v53 }
 0x24f   :  { %v688_v60 = vpop.eup %687 }
 0x250   :  { %v330_v61 = vmul.f32 %v688_v60, %v322_v57  ;;  %v358_v62 = vadd.f32 %v354_v52, %v343_v58  ;;  %v329_v63 = vmul.f32 %v688_v60, %v321_v56  ;;  %v357_v2 = vadd.f32 %v350_v51, %v342_v59 }
 0x252   :  { %v345_v3 = vmul.f32 %v339_v48, %v330_v61  ;;  %v344_v4 = vmul.f32 %v335_v47, %v329_v63  ;;  %v366_v8 = vmul.f32 0.1, %v358_v62  ;;  %v365_v54 = vmul.f32 0.1, %v357_v2 }
 0x253   :  { %vm362_vm2 = vcmp.ge.f32.partialorder %v358_v62, 0.0  ;;  %vm361_vm3 = vcmp.ge.f32.partialorder %v357_v2, 0.0 }
 0x254   :  { %v360_v7 = vadd.f32 %v354_v52, %v345_v3  ;;  %v359_v9 = vadd.f32 %v350_v51, %v344_v4  ;;  %v370_v6 = vsel %vm362_vm2, %v358_v62, %v366_v8  ;;  %v369_v11 = vsel %vm361_vm3, %v357_v2, %v365_v54 }
 0x256   :  { %vm364_vm4 = vcmp.ge.f32.partialorder %v360_v7, 0.0  ;;  %v368_v55 = vmul.f32 0.1, %v360_v7  ;;  %vm363_vm5 = vcmp.ge.f32.partialorder %v359_v9, 0.0  ;;  %v367_v5 = vmul.f32 0.1, %v359_v9 }
 0x258   :  { %v372_v10 = vsel %vm364_vm4, %v360_v7, %v368_v55  ;;  %v371_v12 = vsel %vm363_vm5, %v359_v9, %v367_v5 }
 0x259   :  { %v374_v13 = vpack.c.bf16 %v372_v10, %v370_v6  ;;  %v373_v14 = vpack.c.bf16 %v371_v12, %v369_v11 }
 0x25b   :  { %542 = vmatprep.mubr.bf16.mxu1 %v374_v13 }
 0x25c   :  { %543 = vmatmul.mubr.bf16.vlgmr.msra.gmra.mxu1 %v373_v14 }
 0x31c   :  { %v625_v15 = vpop.f32.mrf.mxu1 }
 0x31e   :  { %v626_v17 = vpop.f32.mrf.mxu1 }
 0x31f   :  { %v627_v18 = vadd.f32 %v626_v17, %v625_v15 }
 0x320   :  { %v628_v19 = vpop.f32.mrf.mxu1 }
 0x321   :  { %v545_v20 = vadd.f32 %v627_v18, %v592_v16 }
 0x322   :  { %v629_v21 = vpop.f32.mrf.mxu1 }
 0x323   :  { %v551_v22 = vadd.f32 %v545_v20, %v875_v0  ;;  %v630_v23 = vadd.f32 %v629_v21, %v628_v19 }
 0x325   :  { %553 = vst [vmem:[#allocation10] sm:$0xff] %v551_v22  ;;  %v548_v24 = vadd.f32 %v630_v23, %v592_v16 }
 0x327   :  { %v552_v25 = vadd.f32 %v548_v24, %v877_v1 }
 0x329   :  { %554 = vst [vmem:[#allocation10 + $0x8] sm:$0xff] %v552_v25 }
 0x32a   :  { %780 = shalt.err (!%p777_p10)
}
 0x32b   :  { %566 = dma.vmem_to_hbm [thread:$0]  %s561_s16, 256, %s953_s9, [#allocation4], %s799_s18, %s799_s18, %s800_s19  }
 0x32c   :  { %795 = dma.done.wait [#allocation4], 256  }
 0x32d   :  { %796 = vsyncadd [#allocation4], 4294967040 }
 0x32e   :  { %570 = vsyncpa [#allocation3], 1 }
 0x32f   :  { %571 = vsyncpa [#allocation6], 1 }
 0x330   :  { %572 = vsyncpa [#allocation9], 1 }
 0x331   :  { %573 = vsyncpa [#allocation4], 1 }

</bundles_post_ra>
